<compile_context>
chip_gen: v7x
topology: tpu7x:2x2x1
jax: 0.10.0
libtpu: 0.0.40
codegen_flags: <defaults>
</compile_context>

<pallas_src>
import functools

import jax
import jax.numpy as jnp
from jax import lax
from jax.experimental import pallas as pl
from jax.experimental.pallas import tpu as pltpu


# ---------------------------------------------------------------------------
# Stage 1a: whole table resident in VMEM (small-table fast path).
# ---------------------------------------------------------------------------
def _embed_mean_vmem_kernel(idx_ref, table_ref, o_ref, *, batch, context):
    """Gather + context-mean with the embedding table resident in VMEM.

    idx_ref  : SMEM (B*C,) int32, row-major flattened (i = b*C + c).
    table_ref: VMEM (V, E)  embedding table (one bulk DMA brought it in).
    o_ref    : VMEM (B, E)  f32 context-mean embeddings.
    """
    inv = 1.0 / context
    for b in range(batch):          # small static unroll (B*C capped by caller)
        acc = table_ref[pl.ds(idx_ref[b * context], 1), :].astype(jnp.float32)
        for c in range(1, context):
            acc = acc + table_ref[pl.ds(idx_ref[b * context + c], 1), :].astype(jnp.float32)
        o_ref[pl.ds(b, 1), :] = acc * inv


# ---------------------------------------------------------------------------
# Stage 1b: manual HBM row-gather DMAs (large-table fallback).
# ---------------------------------------------------------------------------
def _embed_mean_gather_kernel(idx_ref, table_ref, o_ref, rows_ref, sem,
                              *, batch, context, window):
    """Gather B*C rows from an HBM table via manual DMAs, then context-mean.

    idx_ref  : SMEM (B*C,) int32, context-major flattened (i = c*B + b).
    table_ref: HBM  (V, E)  embedding table (memory_space=pl.ANY).
    o_ref    : VMEM (B, E)  f32 context-mean embeddings.
    rows_ref : VMEM (B*C, E) sublane-dense landing buffer for gathered rows.
    sem      : DMA semaphore ring of length `window`.
    """
    n = batch * context

    def start_copy(i, tok, slot):
        pltpu.make_async_copy(
            table_ref.at[pl.ds(tok, 1)],    # (1, E) row of the table in HBM
            rows_ref.at[pl.ds(i, 1)],       # (1, E) landing row in VMEM
            sem.at[slot],
        ).start()

    def wait_copy(slot):
        # Only the transfer size and the semaphore matter for the wait.
        pltpu.make_async_copy(
            table_ref.at[pl.ds(0, 1)], rows_ref.at[pl.ds(0, 1)], sem.at[slot]
        ).wait()

    # Prime the DMA window (static, unrolled).
    for i in range(min(window, n)):
        start_copy(i, idx_ref[i], i)

    # Drain row i while keeping up to `window` gathers in flight.
    @pl.loop(0, n)
    def _(i):
        nxt = i + window
        # Read the next token id BEFORE the wait (avoids the SMEM sst->sld stall).
        nxt_tok = idx_ref[jnp.minimum(nxt, n - 1)]
        wait_copy(i % window)

        @pl.when(nxt < n)
        def _():
            start_copy(nxt, nxt_tok, nxt % window)

    # Mean over the context axis.  Rows are context-major, so context position
    # c is the contiguous, sublane-dense slab rows_ref[c*B : (c+1)*B, :].
    acc = rows_ref[pl.ds(0, batch), :].astype(jnp.float32)
    for c in range(1, context):
        acc = acc + rows_ref[pl.ds(c * batch, batch), :].astype(jnp.float32)
    o_ref[...] = acc * (1.0 / context)


# ---------------------------------------------------------------------------
# Stage 2: vocab-tiled linear layer.
# ---------------------------------------------------------------------------
def _linear_kernel(x_ref, w_ref, b_ref, o_ref):
    """One (B, TV) tile of logits:  x @ W[tile].T + b[tile].

    x_ref: (B, E)   context-mean embeddings (resident across the grid).
    w_ref: (TV, E)  weight tile in native nn.Linear layout; contracted on E.
    b_ref: (1, TV)  bias tile.
    o_ref: (B, TV)  logits tile (lane-dense).
    """
    x = x_ref[...]
    w = w_ref[...]
    if x.dtype != w.dtype:          # supports bf16-streamed weights
        x = x.astype(w.dtype)
    logits = lax.dot_general(
        x, w,
        dimension_numbers=(((1,), (1,)), ((), ())),
        preferred_element_type=jnp.float32)
    o_ref[...] = (logits + b_ref[...].astype(jnp.float32)).astype(o_ref.dtype)


def _vmem_budget_bytes():
    """~50% of this generation's VMEM capacity (safe fallback: 32 MiB)."""
    try:
        cap = int(pltpu.get_tpu_info().vmem_capacity_bytes)
        if cap > 0:
            return cap // 2
    except Exception:
        pass
    return 32 * 1024 * 1024


def _pick_vocab_tile(vocab, n_embd, w_itemsize, batch, vmem_budget, requested=None):
    if requested is not None:
        if vocab % requested != 0 or requested % 128 != 0:
            raise ValueError("vocab_tile must divide vocab and be a multiple of 128")
        return requested

    def tile_bytes(tv):
        # double-buffered weight/bias/out tiles + resident activations.
        return 2 * (tv * n_embd * w_itemsize + tv * 4 + batch * tv * 4) + batch * n_embd * 4

    cands = [c for c in (16384, 8192, 4096, 2048, 1024, 512, 256, 128) if vocab % c == 0]
    # Keep >= 2 grid steps when possible so the "parallel" vocab axis can be
    # sharded across v7x's two TensorCores.
    multi = [c for c in cands if vocab // c >= 2]
    if multi:
        cands = multi
    for c in cands:                      # largest tile that fits the VMEM budget
        if tile_bytes(c) <= vmem_budget:
            return c
    if cands:
        return cands[-1]
    return vocab  # awkward vocab: single un-tiled (masked-store) block


def cbow_forward(idx, table, weight, bias, *, vocab_tile=None, gather_window=16,
                 gather_from_hbm=None):
    """CBOW forward: logits = mean(table[idx], axis=1) @ weight.T + bias.

    idx    : (B, C) integer token ids
    table  : (V, E) embedding table
    weight : (V, E) linear weight (PyTorch nn.Linear layout, NOT transposed)
    bias   : (V,)   linear bias
    gather_from_hbm: None = auto (VMEM-resident table when it fits),
                     True/False to force the HBM-gather / VMEM-table path.
    returns: (B, V) float32 logits
    """
    B, C = idx.shape
    V, E = table.shape
    assert weight.shape == (V, E) and bias.shape == (V,)

    vmem_budget = _vmem_budget_bytes()

    # Clamp ids so a bad token cannot read out of bounds.
    # TODO(synk): PyTorch nn.Embedding raises on out-of-range ids instead of clamping.
    idx_i32 = jnp.clip(idx, 0, V - 1).astype(jnp.int32)

    t_item = jnp.dtype(table.dtype).itemsize
    table_bytes = V * E * t_item
    small_table = (table_bytes <= min(16 * 1024 * 1024, vmem_budget // 2)
                   and B * C <= 1024)
    use_vmem_table = small_table if gather_from_hbm is None else (not gather_from_hbm)

    # ---- Stage 1: embedding gather + context mean ----
    if use_vmem_table:
        # Whole table in VMEM (one bulk DMA) + dynamic indexed loads.
        idx_flat = idx_i32.reshape(-1)                      # row-major: i = b*C + c
        s1_limit = int(min(max(table_bytes + 4 * B * E * 4 + (2 << 20), 8 << 20),
                           vmem_budget))
        emb_mean = pl.pallas_call(
            functools.partial(_embed_mean_vmem_kernel, batch=B, context=C),
            out_shape=jax.ShapeDtypeStruct((B, E), jnp.float32),
            in_specs=[pl.BlockSpec(memory_space=pltpu.MemorySpace.SMEM),   # ids
                      pl.BlockSpec(memory_space=pltpu.MemorySpace.VMEM)],  # whole table
            out_specs=pl.BlockSpec(memory_space=pltpu.MemorySpace.VMEM),
            compiler_params=pltpu.CompilerParams(vmem_limit_bytes=s1_limit),
        )(idx_flat, table)
    else:
        # Table stays in HBM; manual row-gather DMAs with a deep window.
        idx_flat = idx_i32.T.reshape(-1)                    # context-major: i = c*B + b
        window = int(max(1, min(gather_window, B * C)))
        rows_bytes = B * C * E * t_item
        s1_limit = int(min(max(rows_bytes + 4 * B * E * 4 + (2 << 20), 8 << 20),
                           vmem_budget))
        emb_mean = pl.pallas_call(
            functools.partial(_embed_mean_gather_kernel,
                              batch=B, context=C, window=window),
            out_shape=jax.ShapeDtypeStruct((B, E), jnp.float32),
            in_specs=[pl.BlockSpec(memory_space=pltpu.MemorySpace.SMEM),   # ids
                      pl.BlockSpec(memory_space=pl.ANY)],                  # table in HBM
            out_specs=pl.BlockSpec(memory_space=pltpu.MemorySpace.VMEM),
            scratch_shapes=[pltpu.VMEM((B * C, E), table.dtype),           # 2-D landing buf
                            pltpu.SemaphoreType.DMA((window,))],
            compiler_params=pltpu.CompilerParams(vmem_limit_bytes=s1_limit),
        )(idx_flat, table)

    # ---- Stage 2: vocab-tiled linear layer (weight-streaming / HBM bound) ----
    w_item = jnp.dtype(weight.dtype).itemsize
    tv = _pick_vocab_tile(V, E, w_item, B, vmem_budget, vocab_tile)
    bias2d = bias.reshape(1, V)

    tile_bytes = 2 * (tv * E * w_item + tv * 4 + B * tv * 4) + B * E * 4
    s2_limit = int(min(max(2 * tile_bytes, 8 * 1024 * 1024), vmem_budget))

    # TODO(synk): optionally fuse stage 1 into a prologue of this kernel to save
    # one launch + one (B,E) HBM round trip (needs the vocab axis "arbitrary",
    # or a per-core prologue, under v7x megacore).
    return pl.pallas_call(
        _linear_kernel,
        out_shape=jax.ShapeDtypeStruct((B, V), jnp.float32),
        grid_spec=pltpu.PrefetchScalarGridSpec(
            num_scalar_prefetch=0,
            grid=(V // tv,),
            in_specs=[pl.BlockSpec((B, E), lambda j: (0, 0)),    # resident activations
                      pl.BlockSpec((tv, E), lambda j: (j, 0)),   # streamed weight tiles
                      pl.BlockSpec((1, tv), lambda j: (0, j))],  # bias tile
            out_specs=pl.BlockSpec((B, tv), lambda j: (0, j)),   # lane-dense output tile
        ),
        compiler_params=pltpu.CompilerParams(
            dimension_semantics=("parallel",),   # independent V tiles; megacore on v7x
            vmem_limit_bytes=s2_limit),
    )(emb_mean, weight, bias2d)


if __name__ == "__main__":
    # Small shapes consistent with the module.
    batch = 8
    context = 8          # number of context tokens averaged over
    n_embd = 128
    vocab_size = 512

    key = jax.random.PRNGKey(0)
    k_idx, k_emb, k_w, k_b = jax.random.split(key, 4)

    emb_table = jax.random.normal(k_emb, (vocab_size, n_embd), jnp.float32) * 0.02
    lin_w = jax.random.normal(k_w, (vocab_size, n_embd), jnp.float32) * 0.02
    lin_b = jax.random.normal(k_b, (vocab_size,), jnp.float32) * 0.02
    x = jax.random.randint(k_idx, (batch, context), 0, vocab_size, jnp.int32)

    # Pure-JAX reference of the same semantics.
    ref = jnp.mean(emb_table[x], axis=1) @ lin_w.T + lin_b

    # Fast path: whole embedding table resident in VMEM (auto-selected here).
    out = jax.block_until_ready(cbow_forward(x, emb_table, lin_w, lin_b))
    assert out.shape == (batch, vocab_size)
    assert jnp.allclose(out, ref, atol=1e-4, rtol=1e-4), float(jnp.max(jnp.abs(out - ref)))

    # Fallback path: manual HBM row-gather DMAs (exercised explicitly for coverage).
    out_g = jax.block_until_ready(
        cbow_forward(x, emb_table, lin_w, lin_b, gather_from_hbm=True))
    assert jnp.allclose(out_g, ref, atol=1e-4, rtol=1e-4), float(jnp.max(jnp.abs(out_g - ref)))

    print("KERNEL_OK")
</pallas_src>

<mosaic_0001>
module attributes {stable_mosaic.version = 11 : i64} {
  func.func @_embed_mean_vmem_kernel(%arg0: memref<64xi32, #tpu.memory_space<smem>>, %arg1: memref<512x128xf32, #tpu.memory_space<vmem>>, %arg2: memref<8x128xf32, #tpu.memory_space<vmem>>) attributes {dimension_semantics = [], scalar_prefetch = 0 : i64, scratch_operands = 0 : i64, tpu.core_type = #tpu.core_type<tc>} {
    %c0 = arith.constant 0 : index
    %0 = memref.load %arg0[%c0] : memref<64xi32, #tpu.memory_space<smem>>
    %1 = arith.index_cast %0 : i32 to index
    %c0_0 = arith.constant 0 : index
    %2 = vector.load %arg1[%1, %c0_0] : memref<512x128xf32, #tpu.memory_space<vmem>>, vector<1x128xf32>
    %c1 = arith.constant 1 : index
    %3 = memref.load %arg0[%c1] : memref<64xi32, #tpu.memory_space<smem>>
    %4 = arith.index_cast %3 : i32 to index
    %c0_1 = arith.constant 0 : index
    %5 = vector.load %arg1[%4, %c0_1] : memref<512x128xf32, #tpu.memory_space<vmem>>, vector<1x128xf32>
    %6 = arith.addf %2, %5 : vector<1x128xf32>
    %c2 = arith.constant 2 : index
    %7 = memref.load %arg0[%c2] : memref<64xi32, #tpu.memory_space<smem>>
    %8 = arith.index_cast %7 : i32 to index
    %c0_2 = arith.constant 0 : index
    %9 = vector.load %arg1[%8, %c0_2] : memref<512x128xf32, #tpu.memory_space<vmem>>, vector<1x128xf32>
    %10 = arith.addf %6, %9 : vector<1x128xf32>
    %c3 = arith.constant 3 : index
    %11 = memref.load %arg0[%c3] : memref<64xi32, #tpu.memory_space<smem>>
    %12 = arith.index_cast %11 : i32 to index
    %c0_3 = arith.constant 0 : index
    %13 = vector.load %arg1[%12, %c0_3] : memref<512x128xf32, #tpu.memory_space<vmem>>, vector<1x128xf32>
    %14 = arith.addf %10, %13 : vector<1x128xf32>
    %c4 = arith.constant 4 : index
    %15 = memref.load %arg0[%c4] : memref<64xi32, #tpu.memory_space<smem>>
    %16 = arith.index_cast %15 : i32 to index
    %c0_4 = arith.constant 0 : index
    %17 = vector.load %arg1[%16, %c0_4] : memref<512x128xf32, #tpu.memory_space<vmem>>, vector<1x128xf32>
    %18 = arith.addf %14, %17 : vector<1x128xf32>
    %c5 = arith.constant 5 : index
    %19 = memref.load %arg0[%c5] : memref<64xi32, #tpu.memory_space<smem>>
    %20 = arith.index_cast %19 : i32 to index
    %c0_5 = arith.constant 0 : index
    %21 = vector.load %arg1[%20, %c0_5] : memref<512x128xf32, #tpu.memory_space<vmem>>, vector<1x128xf32>
    %22 = arith.addf %18, %21 : vector<1x128xf32>
    %c6 = arith.constant 6 : index
    %23 = memref.load %arg0[%c6] : memref<64xi32, #tpu.memory_space<smem>>
    %24 = arith.index_cast %23 : i32 to index
    %c0_6 = arith.constant 0 : index
    %25 = vector.load %arg1[%24, %c0_6] : memref<512x128xf32, #tpu.memory_space<vmem>>, vector<1x128xf32>
    %26 = arith.addf %22, %25 : vector<1x128xf32>
    %c7 = arith.constant 7 : index
    %27 = memref.load %arg0[%c7] : memref<64xi32, #tpu.memory_space<smem>>
    %28 = arith.index_cast %27 : i32 to index
    %c0_7 = arith.constant 0 : index
    %29 = vector.load %arg1[%28, %c0_7] : memref<512x128xf32, #tpu.memory_space<vmem>>, vector<1x128xf32>
    %30 = arith.addf %26, %29 : vector<1x128xf32>
    %cst = arith.constant 1.250000e-01 : f32
    %31 = vector.broadcast %cst : f32 to vector<1x128xf32>
    %32 = arith.mulf %30, %31 : vector<1x128xf32>
    %c0_8 = arith.constant 0 : index
    %c0_9 = arith.constant 0 : index
    %33 = vector.load %arg2[%c0_8, %c0_9] : memref<8x128xf32, #tpu.memory_space<vmem>>, vector<1x128xf32>
    tpu.vector_store %arg2[%c0_8, %c0_9], %32 {strides = array<i32>} : memref<8x128xf32, #tpu.memory_space<vmem>>, vector<1x128xf32>,
    %c8 = arith.constant 8 : index
    %34 = memref.load %arg0[%c8] : memref<64xi32, #tpu.memory_space<smem>>
    %35 = arith.index_cast %34 : i32 to index
    %c0_10 = arith.constant 0 : index
    %36 = vector.load %arg1[%35, %c0_10] : memref<512x128xf32, #tpu.memory_space<vmem>>, vector<1x128xf32>
    %c9 = arith.constant 9 : index
    %37 = memref.load %arg0[%c9] : memref<64xi32, #tpu.memory_space<smem>>
    %38 = arith.index_cast %37 : i32 to index
    %c0_11 = arith.constant 0 : index
    %39 = vector.load %arg1[%38, %c0_11] : memref<512x128xf32, #tpu.memory_space<vmem>>, vector<1x128xf32>
    %40 = arith.addf %36, %39 : vector<1x128xf32>
    %c10 = arith.constant 10 : index
    %41 = memref.load %arg0[%c10] : memref<64xi32, #tpu.memory_space<smem>>
    %42 = arith.index_cast %41 : i32 to index
    %c0_12 = arith.constant 0 : index
    %43 = vector.load %arg1[%42, %c0_12] : memref<512x128xf32, #tpu.memory_space<vmem>>, vector<1x128xf32>
    %44 = arith.addf %40, %43 : vector<1x128xf32>
    %c11 = arith.constant 11 : index
    %45 = memref.load %arg0[%c11] : memref<64xi32, #tpu.memory_space<smem>>
    %46 = arith.index_cast %45 : i32 to index
    %c0_13 = arith.constant 0 : index
    %47 = vector.load %arg1[%46, %c0_13] : memref<512x128xf32, #tpu.memory_space<vmem>>, vector<1x128xf32>
    %48 = arith.addf %44, %47 : vector<1x128xf32>
    %c12 = arith.constant 12 : index
    %49 = memref.load %arg0[%c12] : memref<64xi32, #tpu.memory_space<smem>>
    %50 = arith.index_cast %49 : i32 to index
    %c0_14 = arith.constant 0 : index
    %51 = vector.load %arg1[%50, %c0_14] : memref<512x128xf32, #tpu.memory_space<vmem>>, vector<1x128xf32>
    %52 = arith.addf %48, %51 : vector<1x128xf32>
    %c13 = arith.constant 13 : index
    %53 = memref.load %arg0[%c13] : memref<64xi32, #tpu.memory_space<smem>>
    %54 = arith.index_cast %53 : i32 to index
    %c0_15 = arith.constant 0 : index
    %55 = vector.load %arg1[%54, %c0_15] : memref<512x128xf32, #tpu.memory_space<vmem>>, vector<1x128xf32>
    %56 = arith.addf %52, %55 : vector<1x128xf32>
    %c14 = arith.constant 14 : index
    %57 = memref.load %arg0[%c14] : memref<64xi32, #tpu.memory_space<smem>>
    %58 = arith.index_cast %57 : i32 to index
    %c0_16 = arith.constant 0 : index
    %59 = vector.load %arg1[%58, %c0_16] : memref<512x128xf32, #tpu.memory_space<vmem>>, vector<1x128xf32>
    %60 = arith.addf %56, %59 : vector<1x128xf32>
    %c15 = arith.constant 15 : index
    %61 = memref.load %arg0[%c15] : memref<64xi32, #tpu.memory_space<smem>>
    %62 = arith.index_cast %61 : i32 to index
    %c0_17 = arith.constant 0 : index
    %63 = vector.load %arg1[%62, %c0_17] : memref<512x128xf32, #tpu.memory_space<vmem>>, vector<1x128xf32>
    %64 = arith.addf %60, %63 : vector<1x128xf32>
    %cst_18 = arith.constant 1.250000e-01 : f32
    %65 = vector.broadcast %cst_18 : f32 to vector<1x128xf32>
    %66 = arith.mulf %64, %65 : vector<1x128xf32>
    %c1_19 = arith.constant 1 : index
    %c0_20 = arith.constant 0 : index
    %67 = vector.load %arg2[%c1_19, %c0_20] : memref<8x128xf32, #tpu.memory_space<vmem>>, vector<1x128xf32>
    tpu.vector_store %arg2[%c1_19, %c0_20], %66 {strides = array<i32>} : memref<8x128xf32, #tpu.memory_space<vmem>>, vector<1x128xf32>,
    %c16 = arith.constant 16 : index
    %68 = memref.load %arg0[%c16] : memref<64xi32, #tpu.memory_space<smem>>
    %69 = arith.index_cast %68 : i32 to index
    %c0_21 = arith.constant 0 : index
    %70 = vector.load %arg1[%69, %c0_21] : memref<512x128xf32, #tpu.memory_space<vmem>>, vector<1x128xf32>
    %c17 = arith.constant 17 : index
    %71 = memref.load %arg0[%c17] : memref<64xi32, #tpu.memory_space<smem>>
    %72 = arith.index_cast %71 : i32 to index
    %c0_22 = arith.constant 0 : index
    %73 = vector.load %arg1[%72, %c0_22] : memref<512x128xf32, #tpu.memory_space<vmem>>, vector<1x128xf32>
    %74 = arith.addf %70, %73 : vector<1x128xf32>
    %c18 = arith.constant 18 : index
    %75 = memref.load %arg0[%c18] : memref<64xi32, #tpu.memory_space<smem>>
    %76 = arith.index_cast %75 : i32 to index
    %c0_23 = arith.constant 0 : index
    %77 = vector.load %arg1[%76, %c0_23] : memref<512x128xf32, #tpu.memory_space<vmem>>, vector<1x128xf32>
    %78 = arith.addf %74, %77 : vector<1x128xf32>
    %c19 = arith.constant 19 : index
    %79 = memref.load %arg0[%c19] : memref<64xi32, #tpu.memory_space<smem>>
    %80 = arith.index_cast %79 : i32 to index
    %c0_24 = arith.constant 0 : index
    %81 = vector.load %arg1[%80, %c0_24] : memref<512x128xf32, #tpu.memory_space<vmem>>, vector<1x128xf32>
    %82 = arith.addf %78, %81 : vector<1x128xf32>
    %c20 = arith.constant 20 : index
    %83 = memref.load %arg0[%c20] : memref<64xi32, #tpu.memory_space<smem>>
    %84 = arith.index_cast %83 : i32 to index
    %c0_25 = arith.constant 0 : index
    %85 = vector.load %arg1[%84, %c0_25] : memref<512x128xf32, #tpu.memory_space<vmem>>, vector<1x128xf32>
    %86 = arith.addf %82, %85 : vector<1x128xf32>
    %c21 = arith.constant 21 : index
    %87 = memref.load %arg0[%c21] : memref<64xi32, #tpu.memory_space<smem>>
    %88 = arith.index_cast %87 : i32 to index
    %c0_26 = arith.constant 0 : index
    %89 = vector.load %arg1[%88, %c0_26] : memref<512x128xf32, #tpu.memory_space<vmem>>, vector<1x128xf32>
    %90 = arith.addf %86, %89 : vector<1x128xf32>
    %c22 = arith.constant 22 : index
    %91 = memref.load %arg0[%c22] : memref<64xi32, #tpu.memory_space<smem>>
    %92 = arith.index_cast %91 : i32 to index
    %c0_27 = arith.constant 0 : index
    %93 = vector.load %arg1[%92, %c0_27] : memref<512x128xf32, #tpu.memory_space<vmem>>, vector<1x128xf32>
    %94 = arith.addf %90, %93 : vector<1x128xf32>
    %c23 = arith.constant 23 : index
    %95 = memref.load %arg0[%c23] : memref<64xi32, #tpu.memory_space<smem>>
    %96 = arith.index_cast %95 : i32 to index
    %c0_28 = arith.constant 0 : index
    %97 = vector.load %arg1[%96, %c0_28] : memref<512x128xf32, #tpu.memory_space<vmem>>, vector<1x128xf32>
    %98 = arith.addf %94, %97 : vector<1x128xf32>
    %cst_29 = arith.constant 1.250000e-01 : f32
    %99 = vector.broadcast %cst_29 : f32 to vector<1x128xf32>
    %100 = arith.mulf %98, %99 : vector<1x128xf32>
    %c2_30 = arith.constant 2 : index
    %c0_31 = arith.constant 0 : index
    %101 = vector.load %arg2[%c2_30, %c0_31] : memref<8x128xf32, #tpu.memory_space<vmem>>, vector<1x128xf32>
    tpu.vector_store %arg2[%c2_30, %c0_31], %100 {strides = array<i32>} : memref<8x128xf32, #tpu.memory_space<vmem>>, vector<1x128xf32>,
    %c24 = arith.constant 24 : index
    %102 = memref.load %arg0[%c24] : memref<64xi32, #tpu.memory_space<smem>>
    %103 = arith.index_cast %102 : i32 to index
    %c0_32 = arith.constant 0 : index
    %104 = vector.load %arg1[%103, %c0_32] : memref<512x128xf32, #tpu.memory_space<vmem>>, vector<1x128xf32>
    %c25 = arith.constant 25 : index
    %105 = memref.load %arg0[%c25] : memref<64xi32, #tpu.memory_space<smem>>
    %106 = arith.index_cast %105 : i32 to index
    %c0_33 = arith.constant 0 : index
    %107 = vector.load %arg1[%106, %c0_33] : memref<512x128xf32, #tpu.memory_space<vmem>>, vector<1x128xf32>
    %108 = arith.addf %104, %107 : vector<1x128xf32>
    %c26 = arith.constant 26 : index
    %109 = memref.load %arg0[%c26] : memref<64xi32, #tpu.memory_space<smem>>
    %110 = arith.index_cast %109 : i32 to index
    %c0_34 = arith.constant 0 : index
    %111 = vector.load %arg1[%110, %c0_34] : memref<512x128xf32, #tpu.memory_space<vmem>>, vector<1x128xf32>
    %112 = arith.addf %108, %111 : vector<1x128xf32>
    %c27 = arith.constant 27 : index
    %113 = memref.load %arg0[%c27] : memref<64xi32, #tpu.memory_space<smem>>
    %114 = arith.index_cast %113 : i32 to index
    %c0_35 = arith.constant 0 : index
    %115 = vector.load %arg1[%114, %c0_35] : memref<512x128xf32, #tpu.memory_space<vmem>>, vector<1x128xf32>
    %116 = arith.addf %112, %115 : vector<1x128xf32>
    %c28 = arith.constant 28 : index
    %117 = memref.load %arg0[%c28] : memref<64xi32, #tpu.memory_space<smem>>
    %118 = arith.index_cast %117 : i32 to index
    %c0_36 = arith.constant 0 : index
    %119 = vector.load %arg1[%118, %c0_36] : memref<512x128xf32, #tpu.memory_space<vmem>>, vector<1x128xf32>
    %120 = arith.addf %116, %119 : vector<1x128xf32>
    %c29 = arith.constant 29 : index
    %121 = memref.load %arg0[%c29] : memref<64xi32, #tpu.memory_space<smem>>
    %122 = arith.index_cast %121 : i32 to index
    %c0_37 = arith.constant 0 : index
    %123 = vector.load %arg1[%122, %c0_37] : memref<512x128xf32, #tpu.memory_space<vmem>>, vector<1x128xf32>
    %124 = arith.addf %120, %123 : vector<1x128xf32>
    %c30 = arith.constant 30 : index
    %125 = memref.load %arg0[%c30] : memref<64xi32, #tpu.memory_space<smem>>
    %126 = arith.index_cast %125 : i32 to index
    %c0_38 = arith.constant 0 : index
    %127 = vector.load %arg1[%126, %c0_38] : memref<512x128xf32, #tpu.memory_space<vmem>>, vector<1x128xf32>
    %128 = arith.addf %124, %127 : vector<1x128xf32>
    %c31 = arith.constant 31 : index
    %129 = memref.load %arg0[%c31] : memref<64xi32, #tpu.memory_space<smem>>
    %130 = arith.index_cast %129 : i32 to index
    %c0_39 = arith.constant 0 : index
    %131 = vector.load %arg1[%130, %c0_39] : memref<512x128xf32, #tpu.memory_space<vmem>>, vector<1x128xf32>
    %132 = arith.addf %128, %131 : vector<1x128xf32>
    %cst_40 = arith.constant 1.250000e-01 : f32
    %133 = vector.broadcast %cst_40 : f32 to vector<1x128xf32>
    %134 = arith.mulf %132, %133 : vector<1x128xf32>
    %c3_41 = arith.constant 3 : index
    %c0_42 = arith.constant 0 : index
    %135 = vector.load %arg2[%c3_41, %c0_42] : memref<8x128xf32, #tpu.memory_space<vmem>>, vector<1x128xf32>
    tpu.vector_store %arg2[%c3_41, %c0_42], %134 {strides = array<i32>} : memref<8x128xf32, #tpu.memory_space<vmem>>, vector<1x128xf32>,
    %c32 = arith.constant 32 : index
    %136 = memref.load %arg0[%c32] : memref<64xi32, #tpu.memory_space<smem>>
    %137 = arith.index_cast %136 : i32 to index
    %c0_43 = arith.constant 0 : index
    %138 = vector.load %arg1[%137, %c0_43] : memref<512x128xf32, #tpu.memory_space<vmem>>, vector<1x128xf32>
    %c33 = arith.constant 33 : index
    %139 = memref.load %arg0[%c33] : memref<64xi32, #tpu.memory_space<smem>>
    %140 = arith.index_cast %139 : i32 to index
    %c0_44 = arith.constant 0 : index
    %141 = vector.load %arg1[%140, %c0_44] : memref<512x128xf32, #tpu.memory_space<vmem>>, vector<1x128xf32>
    %142 = arith.addf %138, %141 : vector<1x128xf32>
    %c34 = arith.constant 34 : index
    %143 = memref.load %arg0[%c34] : memref<64xi32, #tpu.memory_space<smem>>
    %144 = arith.index_cast %143 : i32 to index
    %c0_45 = arith.constant 0 : index
    %145 = vector.load %arg1[%144, %c0_45] : memref<512x128xf32, #tpu.memory_space<vmem>>, vector<1x128xf32>
    %146 = arith.addf %142, %145 : vector<1x128xf32>
    %c35 = arith.constant 35 : index
    %147 = memref.load %arg0[%c35] : memref<64xi32, #tpu.memory_space<smem>>
    %148 = arith.index_cast %147 : i32 to index
    %c0_46 = arith.constant 0 : index
    %149 = vector.load %arg1[%148, %c0_46] : memref<512x128xf32, #tpu.memory_space<vmem>>, vector<1x128xf32>
    %150 = arith.addf %146, %149 : vector<1x128xf32>
    %c36 = arith.constant 36 : index
    %151 = memref.load %arg0[%c36] : memref<64xi32, #tpu.memory_space<smem>>
    %152 = arith.index_cast %151 : i32 to index
    %c0_47 = arith.constant 0 : index
    %153 = vector.load %arg1[%152, %c0_47] : memref<512x128xf32, #tpu.memory_space<vmem>>, vector<1x128xf32>
    %154 = arith.addf %150, %153 : vector<1x128xf32>
    %c37 = arith.constant 37 : index
    %155 = memref.load %arg0[%c37] : memref<64xi32, #tpu.memory_space<smem>>
    %156 = arith.index_cast %155 : i32 to index
    %c0_48 = arith.constant 0 : index
    %157 = vector.load %arg1[%156, %c0_48] : memref<512x128xf32, #tpu.memory_space<vmem>>, vector<1x128xf32>
    %158 = arith.addf %154, %157 : vector<1x128xf32>
    %c38 = arith.constant 38 : index
    %159 = memref.load %arg0[%c38] : memref<64xi32, #tpu.memory_space<smem>>
    %160 = arith.index_cast %159 : i32 to index
    %c0_49 = arith.constant 0 : index
    %161 = vector.load %arg1[%160, %c0_49] : memref<512x128xf32, #tpu.memory_space<vmem>>, vector<1x128xf32>
    %162 = arith.addf %158, %161 : vector<1x128xf32>
    %c39 = arith.constant 39 : index
    %163 = memref.load %arg0[%c39] : memref<64xi32, #tpu.memory_space<smem>>
    %164 = arith.index_cast %163 : i32 to index
    %c0_50 = arith.constant 0 : index
    %165 = vector.load %arg1[%164, %c0_50] : memref<512x128xf32, #tpu.memory_space<vmem>>, vector<1x128xf32>
    %166 = arith.addf %162, %165 : vector<1x128xf32>
    %cst_51 = arith.constant 1.250000e-01 : f32
    %167 = vector.broadcast %cst_51 : f32 to vector<1x128xf32>
    %168 = arith.mulf %166, %167 : vector<1x128xf32>
    %c4_52 = arith.constant 4 : index
    %c0_53 = arith.constant 0 : index
    %169 = vector.load %arg2[%c4_52, %c0_53] : memref<8x128xf32, #tpu.memory_space<vmem>>, vector<1x128xf32>
    tpu.vector_store %arg2[%c4_52, %c0_53], %168 {strides = array<i32>} : memref<8x128xf32, #tpu.memory_space<vmem>>, vector<1x128xf32>,
    %c40 = arith.constant 40 : index
    %170 = memref.load %arg0[%c40] : memref<64xi32, #tpu.memory_space<smem>>
    %171 = arith.index_cast %170 : i32 to index
    %c0_54 = arith.constant 0 : index
    %172 = vector.load %arg1[%171, %c0_54] : memref<512x128xf32, #tpu.memory_space<vmem>>, vector<1x128xf32>
    %c41 = arith.constant 41 : index
    %173 = memref.load %arg0[%c41] : memref<64xi32, #tpu.memory_space<smem>>
    %174 = arith.index_cast %173 : i32 to index
    %c0_55 = arith.constant 0 : index
    %175 = vector.load %arg1[%174, %c0_55] : memref<512x128xf32, #tpu.memory_space<vmem>>, vector<1x128xf32>
    %176 = arith.addf %172, %175 : vector<1x128xf32>
    %c42 = arith.constant 42 : index
    %177 = memref.load %arg0[%c42] : memref<64xi32, #tpu.memory_space<smem>>
    %178 = arith.index_cast %177 : i32 to index
    %c0_56 = arith.constant 0 : index
    %179 = vector.load %arg1[%178, %c0_56] : memref<512x128xf32, #tpu.memory_space<vmem>>, vector<1x128xf32>
    %180 = arith.addf %176, %179 : vector<1x128xf32>
    %c43 = arith.constant 43 : index
    %181 = memref.load %arg0[%c43] : memref<64xi32, #tpu.memory_space<smem>>
    %182 = arith.index_cast %181 : i32 to index
    %c0_57 = arith.constant 0 : index
    %183 = vector.load %arg1[%182, %c0_57] : memref<512x128xf32, #tpu.memory_space<vmem>>, vector<1x128xf32>
    %184 = arith.addf %180, %183 : vector<1x128xf32>
    %c44 = arith.constant 44 : index
    %185 = memref.load %arg0[%c44] : memref<64xi32, #tpu.memory_space<smem>>
    %186 = arith.index_cast %185 : i32 to index
    %c0_58 = arith.constant 0 : index
    %187 = vector.load %arg1[%186, %c0_58] : memref<512x128xf32, #tpu.memory_space<vmem>>, vector<1x128xf32>
    %188 = arith.addf %184, %187 : vector<1x128xf32>
    %c45 = arith.constant 45 : index
    %189 = memref.load %arg0[%c45] : memref<64xi32, #tpu.memory_space<smem>>
    %190 = arith.index_cast %189 : i32 to index
    %c0_59 = arith.constant 0 : index
    %191 = vector.load %arg1[%190, %c0_59] : memref<512x128xf32, #tpu.memory_space<vmem>>, vector<1x128xf32>
    %192 = arith.addf %188, %191 : vector<1x128xf32>
    %c46 = arith.constant 46 : index
    %193 = memref.load %arg0[%c46] : memref<64xi32, #tpu.memory_space<smem>>
    %194 = arith.index_cast %193 : i32 to index
    %c0_60 = arith.constant 0 : index
    %195 = vector.load %arg1[%194, %c0_60] : memref<512x128xf32, #tpu.memory_space<vmem>>, vector<1x128xf32>
    %196 = arith.addf %192, %195 : vector<1x128xf32>
    %c47 = arith.constant 47 : index
    %197 = memref.load %arg0[%c47] : memref<64xi32, #tpu.memory_space<smem>>
    %198 = arith.index_cast %197 : i32 to index
    %c0_61 = arith.constant 0 : index
    %199 = vector.load %arg1[%198, %c0_61] : memref<512x128xf32, #tpu.memory_space<vmem>>, vector<1x128xf32>
    %200 = arith.addf %196, %199 : vector<1x128xf32>
    %cst_62 = arith.constant 1.250000e-01 : f32
    %201 = vector.broadcast %cst_62 : f32 to vector<1x128xf32>
    %202 = arith.mulf %200, %201 : vector<1x128xf32>
    %c5_63 = arith.constant 5 : index
    %c0_64 = arith.constant 0 : index
    %203 = vector.load %arg2[%c5_63, %c0_64] : memref<8x128xf32, #tpu.memory_space<vmem>>, vector<1x128xf32>
    tpu.vector_store %arg2[%c5_63, %c0_64], %202 {strides = array<i32>} : memref<8x128xf32, #tpu.memory_space<vmem>>, vector<1x128xf32>,
    %c48 = arith.constant 48 : index
    %204 = memref.load %arg0[%c48] : memref<64xi32, #tpu.memory_space<smem>>
    %205 = arith.index_cast %204 : i32 to index
    %c0_65 = arith.constant 0 : index
    %206 = vector.load %arg1[%205, %c0_65] : memref<512x128xf32, #tpu.memory_space<vmem>>, vector<1x128xf32>
    %c49 = arith.constant 49 : index
    %207 = memref.load %arg0[%c49] : memref<64xi32, #tpu.memory_space<smem>>
    %208 = arith.index_cast %207 : i32 to index
    %c0_66 = arith.constant 0 : index
    %209 = vector.load %arg1[%208, %c0_66] : memref<512x128xf32, #tpu.memory_space<vmem>>, vector<1x128xf32>
    %210 = arith.addf %206, %209 : vector<1x128xf32>
    %c50 = arith.constant 50 : index
    %211 = memref.load %arg0[%c50] : memref<64xi32, #tpu.memory_space<smem>>
    %212 = arith.index_cast %211 : i32 to index
    %c0_67 = arith.constant 0 : index
    %213 = vector.load %arg1[%212, %c0_67] : memref<512x128xf32, #tpu.memory_space<vmem>>, vector<1x128xf32>
    %214 = arith.addf %210, %213 : vector<1x128xf32>
    %c51 = arith.constant 51 : index
    %215 = memref.load %arg0[%c51] : memref<64xi32, #tpu.memory_space<smem>>
    %216 = arith.index_cast %215 : i32 to index
    %c0_68 = arith.constant 0 : index
    %217 = vector.load %arg1[%216, %c0_68] : memref<512x128xf32, #tpu.memory_space<vmem>>, vector<1x128xf32>
    %218 = arith.addf %214, %217 : vector<1x128xf32>
    %c52 = arith.constant 52 : index
    %219 = memref.load %arg0[%c52] : memref<64xi32, #tpu.memory_space<smem>>
    %220 = arith.index_cast %219 : i32 to index
    %c0_69 = arith.constant 0 : index
    %221 = vector.load %arg1[%220, %c0_69] : memref<512x128xf32, #tpu.memory_space<vmem>>, vector<1x128xf32>
    %222 = arith.addf %218, %221 : vector<1x128xf32>
    %c53 = arith.constant 53 : index
    %223 = memref.load %arg0[%c53] : memref<64xi32, #tpu.memory_space<smem>>
    %224 = arith.index_cast %223 : i32 to index
    %c0_70 = arith.constant 0 : index
    %225 = vector.load %arg1[%224, %c0_70] : memref<512x128xf32, #tpu.memory_space<vmem>>, vector<1x128xf32>
    %226 = arith.addf %222, %225 : vector<1x128xf32>
    %c54 = arith.constant 54 : index
    %227 = memref.load %arg0[%c54] : memref<64xi32, #tpu.memory_space<smem>>
    %228 = arith.index_cast %227 : i32 to index
    %c0_71 = arith.constant 0 : index
    %229 = vector.load %arg1[%228, %c0_71] : memref<512x128xf32, #tpu.memory_space<vmem>>, vector<1x128xf32>
    %230 = arith.addf %226, %229 : vector<1x128xf32>
    %c55 = arith.constant 55 : index
    %231 = memref.load %arg0[%c55] : memref<64xi32, #tpu.memory_space<smem>>
    %232 = arith.index_cast %231 : i32 to index
    %c0_72 = arith.constant 0 : index
    %233 = vector.load %arg1[%232, %c0_72] : memref<512x128xf32, #tpu.memory_space<vmem>>, vector<1x128xf32>
    %234 = arith.addf %230, %233 : vector<1x128xf32>
    %cst_73 = arith.constant 1.250000e-01 : f32
    %235 = vector.broadcast %cst_73 : f32 to vector<1x128xf32>
    %236 = arith.mulf %234, %235 : vector<1x128xf32>
    %c6_74 = arith.constant 6 : index
    %c0_75 = arith.constant 0 : index
    %237 = vector.load %arg2[%c6_74, %c0_75] : memref<8x128xf32, #tpu.memory_space<vmem>>, vector<1x128xf32>
    tpu.vector_store %arg2[%c6_74, %c0_75], %236 {strides = array<i32>} : memref<8x128xf32, #tpu.memory_space<vmem>>, vector<1x128xf32>,
    %c56 = arith.constant 56 : index
    %238 = memref.load %arg0[%c56] : memref<64xi32, #tpu.memory_space<smem>>
    %239 = arith.index_cast %238 : i32 to index
    %c0_76 = arith.constant 0 : index
    %240 = vector.load %arg1[%239, %c0_76] : memref<512x128xf32, #tpu.memory_space<vmem>>, vector<1x128xf32>
    %c57 = arith.constant 57 : index
    %241 = memref.load %arg0[%c57] : memref<64xi32, #tpu.memory_space<smem>>
    %242 = arith.index_cast %241 : i32 to index
    %c0_77 = arith.constant 0 : index
    %243 = vector.load %arg1[%242, %c0_77] : memref<512x128xf32, #tpu.memory_space<vmem>>, vector<1x128xf32>
    %244 = arith.addf %240, %243 : vector<1x128xf32>
    %c58 = arith.constant 58 : index
    %245 = memref.load %arg0[%c58] : memref<64xi32, #tpu.memory_space<smem>>
    %246 = arith.index_cast %245 : i32 to index
    %c0_78 = arith.constant 0 : index
    %247 = vector.load %arg1[%246, %c0_78] : memref<512x128xf32, #tpu.memory_space<vmem>>, vector<1x128xf32>
    %248 = arith.addf %244, %247 : vector<1x128xf32>
    %c59 = arith.constant 59 : index
    %249 = memref.load %arg0[%c59] : memref<64xi32, #tpu.memory_space<smem>>
    %250 = arith.index_cast %249 : i32 to index
    %c0_79 = arith.constant 0 : index
    %251 = vector.load %arg1[%250, %c0_79] : memref<512x128xf32, #tpu.memory_space<vmem>>, vector<1x128xf32>
    %252 = arith.addf %248, %251 : vector<1x128xf32>
    %c60 = arith.constant 60 : index
    %253 = memref.load %arg0[%c60] : memref<64xi32, #tpu.memory_space<smem>>
    %254 = arith.index_cast %253 : i32 to index
    %c0_80 = arith.constant 0 : index
    %255 = vector.load %arg1[%254, %c0_80] : memref<512x128xf32, #tpu.memory_space<vmem>>, vector<1x128xf32>
    %256 = arith.addf %252, %255 : vector<1x128xf32>
    %c61 = arith.constant 61 : index
    %257 = memref.load %arg0[%c61] : memref<64xi32, #tpu.memory_space<smem>>
    %258 = arith.index_cast %257 : i32 to index
    %c0_81 = arith.constant 0 : index
    %259 = vector.load %arg1[%258, %c0_81] : memref<512x128xf32, #tpu.memory_space<vmem>>, vector<1x128xf32>
    %260 = arith.addf %256, %259 : vector<1x128xf32>
    %c62 = arith.constant 62 : index
    %261 = memref.load %arg0[%c62] : memref<64xi32, #tpu.memory_space<smem>>
    %262 = arith.index_cast %261 : i32 to index
    %c0_82 = arith.constant 0 : index
    %263 = vector.load %arg1[%262, %c0_82] : memref<512x128xf32, #tpu.memory_space<vmem>>, vector<1x128xf32>
    %264 = arith.addf %260, %263 : vector<1x128xf32>
    %c63 = arith.constant 63 : index
    %265 = memref.load %arg0[%c63] : memref<64xi32, #tpu.memory_space<smem>>
    %266 = arith.index_cast %265 : i32 to index
    %c0_83 = arith.constant 0 : index
    %267 = vector.load %arg1[%266, %c0_83] : memref<512x128xf32, #tpu.memory_space<vmem>>, vector<1x128xf32>
    %268 = arith.addf %264, %267 : vector<1x128xf32>
    %cst_84 = arith.constant 1.250000e-01 : f32
    %269 = vector.broadcast %cst_84 : f32 to vector<1x128xf32>
    %270 = arith.mulf %268, %269 : vector<1x128xf32>
    %c7_85 = arith.constant 7 : index
    %c0_86 = arith.constant 0 : index
    %271 = vector.load %arg2[%c7_85, %c0_86] : memref<8x128xf32, #tpu.memory_space<vmem>>, vector<1x128xf32>
    tpu.vector_store %arg2[%c7_85, %c0_86], %270 {strides = array<i32>} : memref<8x128xf32, #tpu.memory_space<vmem>>, vector<1x128xf32>,
    return
  }
}

</mosaic_0001>

<bundles_post_ra>
// kernel: tpu_custom_call.1
= control target key start
LH: loop header
LB: loop body
LE: loop exit
PB: predicated region body
PF: predicated region fallthrough
CT: control target
= control target key end

     0   :  { %7 = vsyncpa [#allocation5], 0  ;;  %s640_s0 = inlined_call_operand.hbm [shape: s32[64], index: 0, kind: input, shape index: {}]   ;;  %s641_s1 = inlined_call_operand.hbm [shape: f32[512,128], index: 1, kind: input, shape index: {}]   ;;  %s642_s2 = inlined_call_operand.hbm [shape: f32[8,128], index: 2, kind: output, shape index: {}]  }
   0x1   :  { %8 = vsyncpa [#allocation3], 0 }
   0x2   :  { %9 = vsyncpa [#allocation4], 0  ;;  %s449_s11 = scalar_lea.hbm %s640_s0, 16 }
   0x3   :  { %p450_p0 = scmp.ne.s32.totalorder %s640_s0, %s449_s11  ;;  %p453_p1 = scmp.lt.u32.totalorder %s449_s11, %s640_s0 }
   0x5   :  { %p455_p2 = pnand %p453_p1, %p450_p0 }
   0x7   :  { %458 = shalt.err (!%p455_p2)
}
   0x8   :  { %s509_s16 = smov [#allocation2]   ;;  %s510_s19 = smov [#allocation6]  }
   0x9   :  { %17 = dma.hbm_to_smem %s640_s0, 16, %s509_s16, [#allocation5]  }
   0xa   :  { %s23_s20 = sshll.u32 %s510_s19, 4  ;;  %s459_s23 = scalar_lea.hbm %s641_s1, 8192  ;;  %s24_s20 = int_to_ptr.vmem [resolvable:$true] %s23_s20 }
   0xb   :  { %p460_p3 = scmp.ne.s32.totalorder %s641_s1, %s459_s23  ;;  %p463_p4 = scmp.lt.u32.totalorder %s459_s23, %s641_s1 }
   0xd   :  { %p465_p5 = pnand %p463_p4, %p460_p3 }
   0xf   :  { %468 = shalt.err (!%p465_p5)
}
  0x10   :  { %s469_s28 = scalar_lea.vmem %s24_s20, 8192  ;;  %p474_p7 = scmp.lt.s32.totalorder %s24_s20, %s24_s20 }
  0x11   :  { %p470_p6 = scmp.ne.s32.totalorder %s24_s20, %s469_s28  ;;  %p475_p8 = scmp.lt.s32.totalorder %s469_s28, %s469_s28 }
  0x13   :  { %p476_p9 = por %p475_p8, %p474_p7 }
  0x15   :  { %p477_p10 = pnand %p476_p9, %p470_p6 }
  0x17   :  { %480 = shalt.err (!%p477_p10)
}
  0x18   :  { %s511_s0 = smov 128   ;;  %s512_s29 = smov 8  }
  0x19   :  { %29 = dma.hbm_to_vmem [thread:$0]  %s641_s1, 8192, %s24_s20, [#allocation3], %s511_s0, %s511_s0, %s512_s29  }
  0x1a   :  { %503 = dma.done.wait [#allocation5], 16  }
  0x1b   :  { %504 = vsyncadd [#allocation5], 4294967280 }
  0x1c   :  { %505 = dma.done.wait [#allocation3], 8192  }
  0x1d   :  { %506 = vsyncadd [#allocation3], 4294959104 }
  0x1e   :  { %36 = sfence }
  0x1f   :  { %s37_s4 = sld [smem:[#allocation2]]  ;;  %s381_s5 = sld [smem:[#allocation2 + $0x1]] }
  0x20   :  { %s382_s6 = sld [smem:[#allocation2 + $0x2]]  ;;  %s383_s7 = sld [smem:[#allocation2 + $0x3]] }
  0x21   :  { %s384_s8 = sld [smem:[#allocation2 + $0x4]]  ;;  %s385_s9 = sld [smem:[#allocation2 + $0x5]] }
  0x22   :  { %s553_s10 = sld [smem:[#allocation2 + $0x6]]  ;;  %s555_s11 = sld [smem:[#allocation2 + $0x7]] }
  0x23   :  { %s388_s12 = sld [smem:[#allocation2 + $0x8]]  ;;  %s389_s13 = sld [smem:[#allocation2 + $0x9]] }
  0x24   :  { %s390_s14 = sld [smem:[#allocation2 + $0xa]]  ;;  %s391_s15 = sld [smem:[#allocation2 + $0xb]] }
  0x25   :  { %s38_s1 = scalar_lea.vmem [#allocation6], %s37_s4  ;;  %s41_s16 = scalar_lea.vmem [#allocation6], %s381_s5 }
  0x26   :  { %v39_v0 = vld [vmem:[%s38_s1] sm:$0x1]  ;;  %s45_s17 = scalar_lea.vmem [#allocation6], %s382_s6  ;;  %s49_s18 = scalar_lea.vmem [#allocation6], %s383_s7 }
  0x27   :  { %v42_v1 = vld [vmem:[%s41_s16] sm:$0x1]  ;;  %s53_s19 = scalar_lea.vmem [#allocation6], %s384_s8  ;;  %s57_s20 = scalar_lea.vmem [#allocation6], %s385_s9 }
  0x28   :  { %v43_v2 = vadd.f32 %v42_v1, %v39_v0  ;;  %v46_v3 = vld [vmem:[%s45_s17] sm:$0x1]  ;;  %s392_s24 = sld [smem:[#allocation2 + $0xc]]  ;;  %s393_s26 = sld [smem:[#allocation2 + $0xd]] }
  0x29   :  { %v50_v4 = vld [vmem:[%s49_s18] sm:$0x1]  ;;  %s71_s21 = scalar_lea.vmem [#allocation6], %s388_s12  ;;  %s74_s22 = scalar_lea.vmem [#allocation6], %s389_s13 }
  0x2a   :  { %v47_v5 = vadd.f32 %v46_v3, %v43_v2  ;;  %v54_v6 = vld [vmem:[%s53_s19] sm:$0x1]  ;;  %s78_s23 = scalar_lea.vmem [#allocation6], %s390_s14  ;;  %s82_s25 = scalar_lea.vmem [#allocation6], %s391_s15 }
  0x2b   :  { %v58_v7 = vld [vmem:[%s57_s20] sm:$0x1]  ;;  %s394_s27 = sld [smem:[#allocation2 + $0xe]]  ;;  %s557_s28 = sld [smem:[#allocation2 + $0xf]] }
  0x2c   :  { %v72_v8 = vld [vmem:[%s71_s21] sm:$0x1]  ;;  %v51_v10 = vadd.f32 %v50_v4, %v47_v5  ;;  %s396_s0 = sld [smem:[#allocation2 + $0x10]]  ;;  %s61_s29 = scalar_lea.vmem [#allocation6], %s553_s10 }
  0x2d   :  { %v75_v9 = vld [vmem:[%s74_s22] sm:$0x1]  ;;  %s397_s30 = sld [smem:[#allocation2 + $0x11]]  ;;  %s398_s3 = sld [smem:[#allocation2 + $0x12]] }
  0x2e   :  { %v76_v11 = vadd.f32 %v75_v9, %v72_v8  ;;  %v79_v12 = vld [vmem:[%s78_s23] sm:$0x1]  ;;  %v55_v14 = vadd.f32 %v54_v6, %v51_v10  ;;  %s560_s4 = sld [smem:[#allocation2 + $0x13]]  ;;  %s562_s5 = sld [smem:[#allocation2 + $0x14]] }
  0x2f   :  { %v83_v13 = vld [vmem:[%s82_s25] sm:$0x1]  ;;  %s65_s6 = scalar_lea.vmem [#allocation6], %s555_s11  ;;  %s565_s7 = sld [smem:[#allocation2 + $0x15]] }
  0x30   :  { %v80_v15 = vadd.f32 %v79_v12, %v76_v11  ;;  %v62_v16 = vld [vmem:[%s61_s29] sm:$0x1]  ;;  %v59_v17 = vadd.f32 %v58_v7, %v55_v14  ;;  %s567_s8 = sld [smem:[#allocation2 + $0x16]]  ;;  %s569_s9 = sld [smem:[#allocation2 + $0x17]] }
  0x31   :  { %v66_v19 = vld [vmem:[%s65_s6] sm:$0x1]  ;;  %s86_s12 = scalar_lea.vmem [#allocation6], %s392_s24  ;;  %s90_s10 = scalar_lea.vmem [#allocation6], %s393_s26 }
  0x32   :  { %v84_v18 = vadd.f32 %v83_v13, %v80_v15  ;;  %v63_v20 = vadd.f32 %v62_v16, %v59_v17  ;;  %v87_v21 = vld [vmem:[%s86_s12] sm:$0x1]  ;;  %s94_s13 = scalar_lea.vmem [#allocation6], %s394_s27  ;;  %s104_s14 = scalar_lea.vmem [#allocation6], %s396_s0 }
  0x33   :  { %v91_v24 = vld [vmem:[%s90_s10] sm:$0x1]  ;;  %s107_s11 = scalar_lea.vmem [#allocation6], %s397_s30  ;;  %s111_s15 = scalar_lea.vmem [#allocation6], %s398_s3 }
  0x34   :  { %v67_v22 = vadd.f32 %v66_v19, %v63_v20  ;;  %v88_v23 = vadd.f32 %v87_v21, %v84_v18  ;;  %v95_v25 = vld [vmem:[%s94_s13] sm:$0x1]  ;;  %s98_s1 = scalar_lea.vmem [#allocation6], %s557_s28  ;;  %s115_s16 = scalar_lea.vmem [#allocation6], %s560_s4 }
  0x35   :  { %v105_v26 = vld [vmem:[%s104_s14] sm:$0x1]  ;;  %s404_s17 = sld [smem:[#allocation2 + $0x18]]  ;;  %s119_s18 = scalar_lea.vmem [#allocation6], %s562_s5 }
  0x36   :  { %v68_v27 = vmul.f32 0.125, %v67_v22  ;;  %v92_v28 = vadd.f32 %v91_v24, %v88_v23  ;;  %v108_v29 = vld [vmem:[%s107_s11] sm:$0x1]  ;;  %s405_s19 = sld [smem:[#allocation2 + $0x19]]  ;;  %s406_s20 = sld [smem:[#allocation2 + $0x1a]] }
  0x37   :  { %v112_v30 = vld [vmem:[%s111_s15] sm:$0x1]  ;;  %v109_v32 = vadd.f32 %v108_v29, %v105_v26  ;;  %s123_s21 = scalar_lea.vmem [#allocation6], %s565_s7  ;;  %s407_s22 = sld [smem:[#allocation2 + $0x1b]] }
  0x38   :  { %v99_v31 = vld [vmem:[%s98_s1] sm:$0x1]  ;;  %69 = vst [vmem:[#allocation7] sm:$0x1] %v68_v27  ;;  %v96_v33 = vadd.f32 %v95_v25, %v92_v28  ;;  %s575_s23 = sld [smem:[#allocation2 + $0x1c]]  ;;  %s577_s24 = sld [smem:[#allocation2 + $0x1d]] }
  0x39   :  { %v116_v34 = vld [vmem:[%s115_s16] sm:$0x1]  ;;  %v113_v35 = vadd.f32 %v112_v30, %v109_v32  ;;  %s579_s25 = sld [smem:[#allocation2 + $0x1e]]  ;;  %s581_s26 = sld [smem:[#allocation2 + $0x1f]] }
  0x3a   :  { %v100_v36 = vadd.f32 %v99_v31, %v96_v33  ;;  %v120_v37 = vld [vmem:[%s119_s18] sm:$0x1]  ;;  %s412_s27 = sld [smem:[#allocation2 + $0x20]]  ;;  %s127_s28 = scalar_lea.vmem [#allocation6], %s567_s8 }
  0x3b   :  { %v117_v38 = vadd.f32 %v116_v34, %v113_v35  ;;  %v124_v39 = vld [vmem:[%s123_s21] sm:$0x1]  ;;  %s413_s0 = sld [smem:[#allocation2 + $0x21]]  ;;  %s414_s29 = sld [smem:[#allocation2 + $0x22]] }
  0x3c   :  { %v101_v40 = vmul.f32 0.125, %v100_v36  ;;  %v128_v42 = vld [vmem:[%s127_s28] sm:$0x1]  ;;  %s584_s30 = sld [smem:[#allocation2 + $0x23]]  ;;  %s131_s3 = scalar_lea.vmem [#allocation6], %s569_s9 }
  0x3d   :  { %v121_v41 = vadd.f32 %v120_v37, %v117_v38  ;;  %v132_v44 = vld [vmem:[%s131_s3] sm:$0x1]  ;;  %s137_s4 = scalar_lea.vmem [#allocation6], %s404_s17  ;;  %s140_s5 = scalar_lea.vmem [#allocation6], %s405_s19 }
  0x3e   :  { %102 = vst [vmem:[#allocation7 + $0x1] sm:$0x1] %v101_v40  ;;  %v138_v45 = vld [vmem:[%s137_s4] sm:$0x1]  ;;  %s144_s6 = scalar_lea.vmem [#allocation6], %s406_s20  ;;  %s148_s7 = scalar_lea.vmem [#allocation6], %s407_s22 }
  0x3f   :  { %v125_v43 = vadd.f32 %v124_v39, %v121_v41  ;;  %v141_v47 = vld [vmem:[%s140_s5] sm:$0x1]  ;;  %s152_s8 = scalar_lea.vmem [#allocation6], %s575_s23  ;;  %s156_s13 = scalar_lea.vmem [#allocation6], %s577_s24 }
  0x40   :  { %v145_v48 = vld [vmem:[%s144_s6] sm:$0x1]  ;;  %v142_v49 = vadd.f32 %v141_v47, %v138_v45  ;;  %s170_s12 = scalar_lea.vmem [#allocation6], %s412_s27  ;;  %s416_s14 = sld [smem:[#allocation2 + $0x24]] }
  0x41   :  { %v129_v46 = vadd.f32 %v128_v42, %v125_v43  ;;  %v149_v51 = vld [vmem:[%s148_s7] sm:$0x1]  ;;  %s173_s9 = scalar_lea.vmem [#allocation6], %s413_s0  ;;  %s177_s10 = scalar_lea.vmem [#allocation6], %s414_s29 }
  0x42   :  { %v146_v52 = vadd.f32 %v145_v48, %v142_v49  ;;  %v153_v53 = vld [vmem:[%s152_s8] sm:$0x1]  ;;  %s417_s11 = sld [smem:[#allocation2 + $0x25]]  ;;  %s181_s15 = scalar_lea.vmem [#allocation6], %s584_s30 }
  0x43   :  { %v133_v50 = vadd.f32 %v132_v44, %v129_v46  ;;  %v171_v54 = vld [vmem:[%s170_s12] sm:$0x1]  ;;  %s418_s1 = sld [smem:[#allocation2 + $0x26]]  ;;  %s590_s16 = sld [smem:[#allocation2 + $0x27]] }
  0x44   :  { %v174_v56 = vld [vmem:[%s173_s9] sm:$0x1]  ;;  %v150_v58 = vadd.f32 %v149_v51, %v146_v52  ;;  %s420_s17 = sld [smem:[#allocation2 + $0x28]]  ;;  %s421_s18 = sld [smem:[#allocation2 + $0x29]] }
  0x45   :  { %v134_v55 = vmul.f32 0.125, %v133_v50  ;;  %v178_v57 = vld [vmem:[%s177_s10] sm:$0x1]  ;;  %v175_v60 = vadd.f32 %v174_v56, %v171_v54  ;;  %s160_s19 = scalar_lea.vmem [#allocation6], %s579_s25  ;;  %s422_s20 = sld [smem:[#allocation2 + $0x2a]] }
  0x46   :  { %v157_v59 = vld [vmem:[%s156_s13] sm:$0x1]  ;;  %v154_v62 = vadd.f32 %v153_v53, %v150_v58  ;;  %s593_s21 = sld [smem:[#allocation2 + $0x2b]]  ;;  %s595_s22 = sld [smem:[#allocation2 + $0x2c]] }
  0x47   :  { %135 = vst [vmem:[#allocation7 + $0x2] sm:$0x1] %v134_v55  ;;  %v182_v61 = vld [vmem:[%s181_s15] sm:$0x1]  ;;  %v179_v63 = vadd.f32 %v178_v57, %v175_v60  ;;  %s597_s23 = sld [smem:[#allocation2 + $0x2d]]  ;;  %s164_s24 = scalar_lea.vmem [#allocation6], %s581_s26 }
  0x48   :  { %v161_v0 = vld [vmem:[%s160_s19] sm:$0x1]  ;;  %v158_v1 = vadd.f32 %v157_v59, %v154_v62  ;;  %s600_s27 = sld [smem:[#allocation2 + $0x2e]]  ;;  %s602_s28 = sld [smem:[#allocation2 + $0x2f]] }
  0x49   :  { %v183_v2 = vadd.f32 %v182_v61, %v179_v63  ;;  %v165_v3 = vld [vmem:[%s164_s24] sm:$0x1]  ;;  %s185_s0 = scalar_lea.vmem [#allocation6], %s416_s14  ;;  %s189_s25 = scalar_lea.vmem [#allocation6], %s417_s11 }
  0x4a   :  { %v162_v4 = vadd.f32 %v161_v0, %v158_v1  ;;  %v186_v5 = vld [vmem:[%s185_s0] sm:$0x1]  ;;  %s193_s29 = scalar_lea.vmem [#allocation6], %s418_s1  ;;  %s203_s30 = scalar_lea.vmem [#allocation6], %s420_s17 }
  0x4b   :  { %v190_v6 = vld [vmem:[%s189_s25] sm:$0x1]  ;;  %v187_v8 = vadd.f32 %v186_v5, %v183_v2  ;;  %s206_s26 = scalar_lea.vmem [#allocation6], %s421_s18  ;;  %s210_s3 = scalar_lea.vmem [#allocation6], %s422_s20 }
  0x4c   :  { %v166_v7 = vadd.f32 %v165_v3, %v162_v4  ;;  %v194_v9 = vld [vmem:[%s193_s29] sm:$0x1]  ;;  %s197_s4 = scalar_lea.vmem [#allocation6], %s590_s16  ;;  %s214_s5 = scalar_lea.vmem [#allocation6], %s593_s21 }
  0x4d   :  { %v204_v10 = vld [vmem:[%s203_s30] sm:$0x1]  ;;  %v191_v13 = vadd.f32 %v190_v6, %v187_v8  ;;  %s218_s6 = scalar_lea.vmem [#allocation6], %s595_s22  ;;  %s428_s7 = sld [smem:[#allocation2 + $0x30]] }
  0x4e   :  { %v207_v11 = vld [vmem:[%s206_s26] sm:$0x1]  ;;  %v167_v12 = vmul.f32 0.125, %v166_v7  ;;  %s429_s8 = sld [smem:[#allocation2 + $0x31]]  ;;  %s430_s12 = sld [smem:[#allocation2 + $0x32]] }
  0x4f   :  { %v208_v14 = vadd.f32 %v207_v11, %v204_v10  ;;  %v211_v15 = vld [vmem:[%s210_s3] sm:$0x1]  ;;  %v195_v18 = vadd.f32 %v194_v9, %v191_v13  ;;  %s607_s9 = sld [smem:[#allocation2 + $0x33]]  ;;  %s222_s10 = scalar_lea.vmem [#allocation6], %s597_s23 }
  0x50   :  { %v198_v16 = vld [vmem:[%s197_s4] sm:$0x1]  ;;  %168 = vst [vmem:[#allocation7 + $0x3] sm:$0x1] %v167_v12  ;;  %s610_s13 = sld [smem:[#allocation2 + $0x34]]  ;;  %s612_s14 = sld [smem:[#allocation2 + $0x35]] }
  0x51   :  { %v215_v17 = vld [vmem:[%s214_s5] sm:$0x1]  ;;  %v212_v19 = vadd.f32 %v211_v15, %v208_v14  ;;  %v199_v21 = vadd.f32 %v198_v16, %v195_v18  ;;  %s614_s11 = sld [smem:[#allocation2 + $0x36]]  ;;  %s616_s15 = sld [smem:[#allocation2 + $0x37]] }
  0x52   :  { %v219_v20 = vld [vmem:[%s218_s6] sm:$0x1]  ;;  %s226_s1 = scalar_lea.vmem [#allocation6], %s600_s27  ;;  %s436_s16 = sld [smem:[#allocation2 + $0x38]] }
  0x53   :  { %v216_v22 = vadd.f32 %v215_v17, %v212_v19  ;;  %v223_v23 = vld [vmem:[%s222_s10] sm:$0x1]  ;;  %v200_v24 = vmul.f32 0.125, %v199_v21  ;;  %s437_s17 = sld [smem:[#allocation2 + $0x39]]  ;;  %s438_s18 = sld [smem:[#allocation2 + $0x3a]] }
  0x54   :  { %v227_v26 = vld [vmem:[%s226_s1] sm:$0x1]  ;;  %s619_s19 = sld [smem:[#allocation2 + $0x3b]]  ;;  %s230_s20 = scalar_lea.vmem [#allocation6], %s602_s28 }
  0x55   :  { %v220_v25 = vadd.f32 %v219_v20, %v216_v22  ;;  %201 = vst [vmem:[#allocation7 + $0x4] sm:$0x1] %v200_v24  ;;  %v231_v28 = vld [vmem:[%s230_s20] sm:$0x1]  ;;  %s236_s21 = scalar_lea.vmem [#allocation6], %s428_s7  ;;  %s239_s22 = scalar_lea.vmem [#allocation6], %s429_s8 }
  0x56   :  { %v237_v30 = vld [vmem:[%s236_s21] sm:$0x1]  ;;  %s243_s23 = scalar_lea.vmem [#allocation6], %s430_s12  ;;  %s247_s24 = scalar_lea.vmem [#allocation6], %s607_s9 }
  0x57   :  { %v224_v27 = vadd.f32 %v223_v23, %v220_v25  ;;  %v240_v31 = vld [vmem:[%s239_s22] sm:$0x1]  ;;  %s251_s27 = scalar_lea.vmem [#allocation6], %s610_s13  ;;  %s255_s0 = scalar_lea.vmem [#allocation6], %s612_s14 }
  0x58   :  { %v241_v32 = vadd.f32 %v240_v31, %v237_v30  ;;  %v244_v33 = vld [vmem:[%s243_s23] sm:$0x1]  ;;  %s269_s28 = scalar_lea.vmem [#allocation6], %s436_s16  ;;  %s440_s30 = sld [smem:[#allocation2 + $0x3c]] }
  0x59   :  { %v228_v29 = vadd.f32 %v227_v26, %v224_v27  ;;  %v248_v35 = vld [vmem:[%s247_s24] sm:$0x1]  ;;  %s272_s25 = scalar_lea.vmem [#allocation6], %s437_s17  ;;  %s276_s29 = scalar_lea.vmem [#allocation6], %s438_s18 }
  0x5a   :  { %v245_v36 = vadd.f32 %v244_v33, %v241_v32  ;;  %v252_v37 = vld [vmem:[%s251_s27] sm:$0x1]  ;;  %s280_s26 = scalar_lea.vmem [#allocation6], %s619_s19  ;;  %s441_s3 = sld [smem:[#allocation2 + $0x3d]] }
  0x5b   :  { %v232_v34 = vadd.f32 %v231_v28, %v228_v29  ;;  %v256_v39 = vld [vmem:[%s255_s0] sm:$0x1]  ;;  %s442_s4 = sld [smem:[#allocation2 + $0x3e]]  ;;  %s443_s5 = sld [smem:[#allocation2 + $0x3f]] }
  0x5c   :  { %v270_v40 = vld [vmem:[%s269_s28] sm:$0x1]  ;;  %v249_v42 = vadd.f32 %v248_v35, %v245_v36  ;;  %s259_s6 = scalar_lea.vmem [#allocation6], %s614_s11  ;;  %s263_s7 = scalar_lea.vmem [#allocation6], %s616_s15 }
  0x5d   :  { %v233_v38 = vmul.f32 0.125, %v232_v34  ;;  %v273_v41 = vld [vmem:[%s272_s25] sm:$0x1]  ;;  %s513_s13 = smov [#allocation7]  }
  0x5e   :  { %v274_v43 = vadd.f32 %v273_v41, %v270_v40  ;;  %v277_v44 = vld [vmem:[%s276_s29] sm:$0x1]  ;;  %v253_v46 = vadd.f32 %v252_v37, %v249_v42  ;;  %s284_s8 = scalar_lea.vmem [#allocation6], %s440_s30  ;;  %s307_s14 = sshll.u32 %s513_s13, 4  ;;  %s308_s14 = int_to_ptr.vmem [resolvable:$true] %s307_s14 }
  0x5f   :  { %234 = vst [vmem:[#allocation7 + $0x5] sm:$0x1] %v233_v38  ;;  %v281_v45 = vld [vmem:[%s280_s26] sm:$0x1]  ;;  %s481_s11 = scalar_lea.vmem %s308_s14, 128  ;;  %p486_p12 = scmp.lt.s32.totalorder %s308_s14, %s308_s14 }
  0x60   :  { %v278_v47 = vadd.f32 %v277_v44, %v274_v43  ;;  %v260_v48 = vld [vmem:[%s259_s6] sm:$0x1]  ;;  %v257_v49 = vadd.f32 %v256_v39, %v253_v46  ;;  %s288_s12 = scalar_lea.vmem [#allocation6], %s441_s3  ;;  %p482_p11 = scmp.ne.s32.totalorder %s308_s14, %s481_s11 }
  0x61   :  { %v264_v51 = vld [vmem:[%s263_s7] sm:$0x1]  ;;  %s292_s9 = scalar_lea.vmem [#allocation6], %s442_s4  ;;  %s296_s10 = scalar_lea.vmem [#allocation6], %s443_s5 }
  0x62   :  { %v282_v50 = vadd.f32 %v281_v45, %v278_v47  ;;  %v261_v52 = vadd.f32 %v260_v48, %v257_v49  ;;  %v285_v53 = vld [vmem:[%s284_s8] sm:$0x1]  ;;  %p487_p13 = scmp.lt.s32.totalorder %s481_s11, %s481_s11 }
  0x63   :  { %v289_v56 = vld [vmem:[%s288_s12] sm:$0x1] }
  0x64   :  { %v265_v54 = vadd.f32 %v264_v51, %v261_v52  ;;  %v286_v55 = vadd.f32 %v285_v53, %v282_v50  ;;  %v293_v57 = vld [vmem:[%s292_s9] sm:$0x1]  ;;  %p488_p0 = por %p487_p13, %p486_p12 }
  0x65   :  { %v297_v60 = vld [vmem:[%s296_s10] sm:$0x1] }
  0x66   :  { %v266_v58 = vmul.f32 0.125, %v265_v54  ;;  %v290_v59 = vadd.f32 %v289_v56, %v286_v55  ;;  %p489_p1 = pnand %p488_p0, %p482_p11 }
  0x68   :  { %267 = vst [vmem:[#allocation7 + $0x6] sm:$0x1] %v266_v58  ;;  %v294_v61 = vadd.f32 %v293_v57, %v290_v59 }
  0x6a   :  { %v298_v62 = vadd.f32 %v297_v60, %v294_v61 }
  0x6c   :  { %v299_v63 = vmul.f32 0.125, %v298_v62 }
  0x6e   :  { %300 = vst [vmem:[#allocation7 + $0x7] sm:$0x1] %v299_v63 }
  0x6f   :  { %492 = shalt.err (!%p489_p1)
}
  0x70   :  { %s493_s16 = scalar_lea.hbm %s642_s2, 128 }
  0x71   :  { %p494_p2 = scmp.ne.s32.totalorder %s642_s2, %s493_s16  ;;  %p497_p3 = scmp.lt.u32.totalorder %s493_s16, %s642_s2 }
  0x73   :  { %p499_p4 = pnand %p497_p3, %p494_p2 }
  0x75   :  { %502 = shalt.err (!%p499_p4)
}
  0x76   :  { %310 = dma.vmem_to_hbm [thread:$0]  %s308_s14, 128, %s642_s2, [#allocation4]  }
  0x77   :  { %507 = dma.done.wait [#allocation4], 128  }
  0x78   :  { %508 = vsyncadd [#allocation4], 4294967168 }
  0x79   :  { %314 = vsyncpa [#allocation3], 1 }
  0x7a   :  { %315 = vsyncpa [#allocation4], 1 }
  0x7b   :  { %316 = vsyncpa [#allocation5], 1 }

</bundles_post_ra>
